<compile_context>
chip_gen: v7x
topology: tpu7x:2x2x1
jax: 0.10.0
libtpu: 0.0.40
codegen_flags: <defaults>
</compile_context>

<pallas_src>
import jax
import jax.numpy as jnp
import numpy as np
from jax.experimental import pallas as pl
from jax.experimental.pallas import tpu as pltpu


# ----------------------------------------------------------------------------
# Demo Pallas kernel: lane-dense, input-aliased identity (placeholder only).
# ----------------------------------------------------------------------------
def _identity_kernel(x_ref, o_ref):
    o_ref[...] = x_ref[...]


def _sublane_multiple(dtype) -> int:
    # Sub-32-bit dtypes pack along sublanes: f32 -> 8, bf16/f16 -> 16, int8 -> 32.
    return 32 // jnp.dtype(dtype).itemsize


def pallas_identity(x: jax.Array) -> jax.Array:
    """Whole-array-in-VMEM pass-through with input/output aliasing.

    Expects a lane-dense 2-D slab: last dim a multiple of 128, second-last a
    multiple of the dtype's sublane tile.  No grid, no scalar prefetch — the
    full (tiny) array is resident in VMEM for a single invocation, and the
    output buffer is aliased to the (donated) input so no extra HBM buffer is
    allocated or written back.

    NOTE: for a *true* production pass-through one would simply return `x`
    (metadata only); the kernel exists solely to demonstrate a runnable,
    correctly-specified pallas_call.
    """
    sub = _sublane_multiple(x.dtype)
    assert (
        x.ndim == 2 and x.shape[-1] % 128 == 0 and x.shape[-2] % sub == 0
    ), (x.shape, x.dtype)
    return pl.pallas_call(
        _identity_kernel,
        out_shape=jax.ShapeDtypeStruct(x.shape, x.dtype),
        in_specs=[pl.BlockSpec(memory_space=pltpu.MemorySpace.VMEM)],
        out_specs=pl.BlockSpec(memory_space=pltpu.MemorySpace.VMEM),
        input_output_aliases={0: 0},
    )(x)


# jit'd, input-donating entry point so the aliasing is honored end-to-end
# (the donated input buffer becomes the output buffer — zero extra HBM traffic).
_pallas_identity_donating = jax.jit(pallas_identity, donate_argnums=0)


# ----------------------------------------------------------------------------
# Module port
# ----------------------------------------------------------------------------
class CustomLossPallas:
    """JAX/Pallas port of the (empty) PyTorch CustomLoss module."""

    def __init__(self):
        # Reference __init__ registers no parameters/buffers.
        pass

    def forward(self):
        # Reference forward: `return` -> None.  Exact semantic match.
        # Zero device work: no kernel launch, no HBM traffic, no grid overhead.
        return None

    def __call__(self):
        return self.forward()


if __name__ == "__main__":
    # ---- test / demo only: syncs and host readbacks never live on a prod path.
    key = jax.random.PRNGKey(0)
    # Small NCHW-shaped input, only used to exercise the demo Pallas kernel.
    x = jax.random.normal(key, (2, 4, 16, 16), dtype=jnp.float32)

    # Lane-dense reshape: 2*4*16*16 = 2048 f32 -> (16, 128) == 16 full vregs.
    x_slab = x.reshape(16, 128)
    # Snapshot reference data on host BEFORE donating the device buffer.
    x_host = np.asarray(x_slab)

    # Run the demo Pallas kernel once (input donated / output aliased) and block.
    y = _pallas_identity_donating(x_slab)
    jax.block_until_ready(y)
    assert y.shape == (16, 128) and y.dtype == jnp.float32
    np.testing.assert_array_equal(np.asarray(y), x_host)

    # Exercise the actual module port: must return None like the reference,
    # and must launch no kernel.
    loss_mod = CustomLossPallas()
    out = loss_mod()
    assert out is None

    print("KERNEL_OK")
</pallas_src>

<mosaic_0001>
module attributes {stable_mosaic.version = 11 : i64} {
  func.func @_identity_kernel(%arg0: memref<16x128xf32, #tpu.memory_space<vmem>>, %arg1: memref<16x128xf32, #tpu.memory_space<vmem>>) attributes {dimension_semantics = [], scalar_prefetch = 0 : i64, scratch_operands = 0 : i64, tpu.core_type = #tpu.core_type<tc>} {
    %c0 = arith.constant 0 : index
    %c0_0 = arith.constant 0 : index
    %0 = vector.load %arg0[%c0, %c0_0] : memref<16x128xf32, #tpu.memory_space<vmem>>, vector<16x128xf32>
    %c0_1 = arith.constant 0 : index
    %c0_2 = arith.constant 0 : index
    %1 = vector.load %arg1[%c0_1, %c0_2] : memref<16x128xf32, #tpu.memory_space<vmem>>, vector<16x128xf32>
    tpu.vector_store %arg1[%c0_1, %c0_2], %0 {strides = array<i32>} : memref<16x128xf32, #tpu.memory_space<vmem>>, vector<16x128xf32>,
    return
  }
}

</mosaic_0001>

<bundles_post_ra>
// kernel: pallas_identity.1
= control target key start
LH: loop header
LB: loop body
LE: loop exit
PB: predicated region body
PF: predicated region fallthrough
CT: control target
= control target key end

     0   :  { %6 = vsyncpa [#allocation3], 0  ;;  %s134_s0 = inlined_call_operand.hbm [shape: f32[16,128], index: 0, kind: input, shape index: {}, may-alias: {0,1}]   ;;  %s135_s1 = inlined_call_operand.hbm [shape: f32[16,128], index: 1, kind: output, shape index: {}, may-alias: {0,1}]  }
   0x1   :  { %7 = vsyncpa [#allocation4], 0  ;;  %s96_s6 = smov [#allocation2]   ;;  %s48_s10 = scalar_lea.hbm %s134_s0, 256 }
   0x2   :  { %s13_s7 = sshll.u32 %s96_s6, 4  ;;  %p49_p0 = scmp.ne.s32.totalorder %s134_s0, %s48_s10  ;;  %s14_s7 = int_to_ptr.vmem [resolvable:$true] %s13_s7 }
   0x3   :  { %p52_p1 = scmp.lt.u32.totalorder %s48_s10, %s134_s0 }
   0x5   :  { %p54_p2 = pnand %p52_p1, %p49_p0 }
   0x7   :  { %57 = shalt.err (!%p54_p2)
}
   0x8   :  { %s58_s15 = scalar_lea.vmem %s14_s7, 256  ;;  %p63_p4 = scmp.lt.s32.totalorder %s14_s7, %s14_s7 }
   0x9   :  { %p59_p3 = scmp.ne.s32.totalorder %s14_s7, %s58_s15  ;;  %p64_p5 = scmp.lt.s32.totalorder %s58_s15, %s58_s15 }
   0xb   :  { %p65_p6 = por %p64_p5, %p63_p4 }
   0xd   :  { %p66_p7 = pnand %p65_p6, %p59_p3 }
   0xf   :  { %69 = shalt.err (!%p66_p7)
}
  0x10   :  { %s97_s16 = smov 128   ;;  %s98_s17 = smov 8  }
  0x11   :  { %19 = dma.hbm_to_vmem [thread:$0]  %s134_s0, 256, %s14_s7, [#allocation3], %s97_s16, %s97_s16, %s98_s17  }
  0x12   :  { %92 = dma.done.wait [#allocation3], 256  }
  0x13   :  { %93 = vsyncadd [#allocation3], 4294967040  ;;  %s99_s20 = smov [#allocation5]   ;;  %v23_v0 = vld [vmem:[#allocation2] sm:$0xff]  ;;  %v24_v1 = vld [vmem:[#allocation2 + $0x8] sm:$0xff] }
  0x14   :  { %s32_s21 = sshll.u32 %s99_s20, 4  ;;  %25 = vst [vmem:[#allocation5] sm:$0xff] %v23_v0  ;;  %26 = vst [vmem:[#allocation5 + $0x8] sm:$0xff] %v24_v1  ;;  %s33_s21 = int_to_ptr.vmem [resolvable:$true] %s32_s21 }
  0x15   :  { %s70_s22 = scalar_lea.vmem %s33_s21, 256  ;;  %p75_p9 = scmp.lt.s32.totalorder %s33_s21, %s33_s21 }
  0x16   :  { %p71_p8 = scmp.ne.s32.totalorder %s33_s21, %s70_s22  ;;  %p76_p10 = scmp.lt.s32.totalorder %s70_s22, %s70_s22 }
  0x18   :  { %p77_p11 = por %p76_p10, %p75_p9 }
  0x1a   :  { %p78_p12 = pnand %p77_p11, %p71_p8 }
  0x1c   :  { %81 = shalt.err (!%p78_p12)
}
  0x1d   :  { %s82_s0 = scalar_lea.hbm %s135_s1, 256 }
  0x1e   :  { %p83_p13 = scmp.ne.s32.totalorder %s135_s1, %s82_s0  ;;  %p86_p0 = scmp.lt.u32.totalorder %s82_s0, %s135_s1 }
  0x20   :  { %p88_p1 = pnand %p86_p0, %p83_p13 }
  0x22   :  { %91 = shalt.err (!%p88_p1)
}
  0x23   :  { %38 = dma.vmem_to_hbm [thread:$0]  %s33_s21, 256, %s135_s1, [#allocation4], %s97_s16, %s97_s16, %s98_s17  }
  0x24   :  { %94 = dma.done.wait [#allocation4], 256  }
  0x25   :  { %95 = vsyncadd [#allocation4], 4294967040 }
  0x26   :  { %42 = vsyncpa [#allocation3], 1 }
  0x27   :  { %43 = vsyncpa [#allocation4], 1 }

</bundles_post_ra>
